<compile_context>
chip_gen: v6e
topology: v6e:2x2x1
jax: 0.10.0
libtpu: 0.0.40
codegen_flags: <defaults>
</compile_context>

<pallas_src>
import functools

import jax
import jax.numpy as jnp
from jax.experimental import pallas as pl
from jax.experimental.pallas import tpu as pltpu

F32 = jnp.float32
BF16 = jnp.bfloat16


def _round_up(x, m):
    return ((x + m - 1) // m) * m


# --------------------------- Pallas kernels ---------------------------------

def _gemm_affine_kernel(a_ref, b_ref, s_ref, c_ref, *rest, act, has_res):
    # acc += a @ b  (bf16 MXU, f32 accumulate); at the last K step:
    #   o = act(acc * scale + bias [+ residual])
    if has_res:
        r_ref, o_ref, acc_ref = rest
    else:
        o_ref, acc_ref = rest

    k = pl.program_id(2)

    @pl.when(k == 0)
    def _init():
        acc_ref[...] = jnp.zeros_like(acc_ref)

    acc_ref[...] += jnp.dot(a_ref[...], b_ref[...],
                            preferred_element_type=jnp.float32)

    @pl.when(k == pl.num_programs(2) - 1)
    def _finalize():
        y = acc_ref[...] * s_ref[...] + c_ref[...]
        if has_res:
            y = y + r_ref[...]
        if act == "relu":
            y = jnp.maximum(y, 0.0)
        elif act == "sigmoid":
            y = jax.nn.sigmoid(y)
        o_ref[...] = y


def gemm_affine(a, b, scale, bias, residual=None, act=None):
    """Tiled fused GEMM: act((a @ b) * scale + bias [+ residual]).

    a: (M, K) f32, b: (K, N) f32, scale/bias broadcast over rows,
    residual (optional): (M, N) f32.  Operands are cast to bf16 for the MXU,
    accumulation and the epilogue stay f32.
    """
    M, K = a.shape
    N = b.shape[1]

    # Pad K to a multiple of 128 (zero pad => exact), pick tk dividing it.
    Kp = _round_up(K, 128)
    tk = next(c for c in (512, 384, 256, 128) if Kp % c == 0)
    # M tile (rows), padded so it divides.
    tm = min(256, _round_up(M, 8))
    Mp = _round_up(M, tm)
    # N tile: lane-dense multiples of 128 when possible, else full N.
    if N % 128 == 0:
        tn = 256 if N % 256 == 0 else 128
    else:
        tn = N

    a = jnp.pad(a.astype(F32), ((0, Mp - M), (0, Kp - K))).astype(BF16)
    b = jnp.pad(b.astype(F32), ((0, Kp - K), (0, 0))).astype(BF16)
    scale = scale.astype(F32).reshape(1, N)
    bias = bias.astype(F32).reshape(1, N)

    in_specs = [
        pl.BlockSpec((tm, tk), lambda i, j, k: (i, k)),
        pl.BlockSpec((tk, tn), lambda i, j, k: (k, j)),
        pl.BlockSpec((1, tn), lambda i, j, k: (0, j)),
        pl.BlockSpec((1, tn), lambda i, j, k: (0, j)),
    ]
    args = [a, b, scale, bias]
    if residual is not None:
        r = jnp.pad(residual.astype(F32), ((0, Mp - M), (0, 0)))
        # Index map ignores k -> block stays resident across the K loop.
        in_specs.append(pl.BlockSpec((tm, tn), lambda i, j, k: (i, j)))
        args.append(r)

    out = pl.pallas_call(
        functools.partial(_gemm_affine_kernel, act=act,
                          has_res=residual is not None),
        grid=(Mp // tm, N // tn, Kp // tk),
        in_specs=in_specs,
        out_specs=pl.BlockSpec((tm, tn), lambda i, j, k: (i, j)),
        out_shape=jax.ShapeDtypeStruct((Mp, N), F32),
        scratch_shapes=[pltpu.VMEM((tm, tn), jnp.float32)],
        compiler_params=pltpu.CompilerParams(
            dimension_semantics=("parallel", "parallel", "arbitrary")),
    )(*args)
    return out[:M]


def _max_reduce_kernel(p_ref, o_ref):
    o_ref[...] = jnp.max(p_ref[...], axis=1)


def _spatial_apply_kernel(p_ref, w_ref, x_ref, o_ref):
    # att = sigmoid(<patches, w>)  (VPU mul + cross-lane reduce, no MXU),
    # then apply it to the channel-attended features in the same kernel.
    att = jax.nn.sigmoid(
        jnp.sum(p_ref[...] * w_ref[...], axis=-1, keepdims=True))
    o_ref[...] = x_ref[...] * att


def _cbam_channel_kernel(x_ref, w1_ref, w2_ref, xo_ref, sp_ref):
    # One batch element per grid step: x is (HW, C).
    x = x_ref[0]
    avg = jnp.mean(x, axis=0, keepdims=True)          # (1, C)
    mx = jnp.max(x, axis=0, keepdims=True)            # (1, C)
    stats = jnp.concatenate([avg, mx], axis=0)        # (2, C): one MLP pass

    h = jnp.maximum(
        jnp.dot(stats, w1_ref[...], preferred_element_type=jnp.float32), 0.0)
    y = jnp.dot(h, w2_ref[...], preferred_element_type=jnp.float32)  # (2, C)
    att = jax.nn.sigmoid(y[0:1, :] + y[1:2, :])        # (1, C)

    xca = x * att                                      # channel-attended
    xo_ref[0] = xca
    # Features for spatial attention: [mean_over_C, max_over_C] -> (HW, 2).
    # (Tiny side output: HW*2 floats per image.)
    sp_ref[0] = jnp.concatenate(
        [jnp.mean(xca, axis=1, keepdims=True),
         jnp.max(xca, axis=1, keepdims=True)], axis=1)


# --------------------------- glue helpers ------------------------------------

def extract_patches(x, k, stride, pad, pad_value=0.0):
    """im2col patch extraction (plain JAX glue). Returns (N, Ho, Wo, k*k, C)."""
    N, H, W, C = x.shape
    xp = jnp.pad(x, ((0, 0), (pad, pad), (pad, pad), (0, 0)),
                 constant_values=pad_value)
    Ho = (H + 2 * pad - k) // stride + 1
    Wo = (W + 2 * pad - k) // stride + 1
    cols = []
    for i in range(k):
        for j in range(k):
            cols.append(xp[:, i:i + stride * Ho:stride,
                           j:j + stride * Wo:stride, :])
    cols = jnp.stack(cols, axis=3)
    return cols, (N, Ho, Wo)


def conv_bn_act(x, w, scale, bias, stride, pad, act=None, residual=None):
    """conv (im2col + tiled Pallas GEMM) fused with folded BN affine,
    optional residual add, and activation."""
    cout, cin, k, _ = w.shape
    cols, (N, Ho, Wo) = extract_patches(x, k, stride, pad)
    M = N * Ho * Wo
    a = cols.reshape(M, k * k * cin)
    wmat = jnp.transpose(w, (2, 3, 1, 0)).reshape(k * k * cin, cout)
    res = None if residual is None else residual.reshape(M, cout)
    y = gemm_affine(a, wmat, scale, bias, residual=res, act=act)
    return y.reshape(N, Ho, Wo, cout)


def maxpool2d(x, k=3, stride=2, pad=1):
    cols, (N, Ho, Wo) = extract_patches(x, k, stride, pad, pad_value=-1e30)
    C = x.shape[3]
    M = N * Ho * Wo
    p = cols.reshape(M, k * k, C)
    tm = min(512, _round_up(M, 8))
    Mp = _round_up(M, tm)
    if Mp != M:
        p = jnp.pad(p, ((0, Mp - M), (0, 0), (0, 0)), constant_values=-1e30)
    out = pl.pallas_call(
        _max_reduce_kernel,
        grid=(Mp // tm,),
        in_specs=[pl.BlockSpec((tm, k * k, C), lambda i: (i, 0, 0))],
        out_specs=pl.BlockSpec((tm, C), lambda i: (i, 0)),
        out_shape=jax.ShapeDtypeStruct((Mp, C), F32),
        compiler_params=pltpu.CompilerParams(
            dimension_semantics=("parallel",)),
    )(p)
    return out[:M].reshape(N, Ho, Wo, C)


def cbam(x, params):
    N, H, W, C = x.shape
    HW = H * W
    Cr = params["w1"].shape[1]
    x3 = x.reshape(N, HW, C)

    # Channel attention (stats MLP + sigmoid + apply) + spatial features.
    xca, spfeat = pl.pallas_call(
        _cbam_channel_kernel,
        grid=(N,),
        in_specs=[
            pl.BlockSpec((1, HW, C), lambda i: (i, 0, 0)),
            pl.BlockSpec((C, Cr), lambda i: (0, 0)),
            pl.BlockSpec((Cr, C), lambda i: (0, 0)),
        ],
        out_specs=(
            pl.BlockSpec((1, HW, C), lambda i: (i, 0, 0)),
            pl.BlockSpec((1, HW, 2), lambda i: (i, 0, 0)),
        ),
        out_shape=(
            jax.ShapeDtypeStruct((N, HW, C), F32),
            jax.ShapeDtypeStruct((N, HW, 2), F32),
        ),
        compiler_params=pltpu.CompilerParams(
            dimension_semantics=("parallel",)),
    )(x3, params["w1"], params["w2"])

    # Spatial attention: im2col the 2-channel [mean, max] map (glue), then one
    # fused Pallas kernel: att = sigmoid(patches . w7x7), out = xca * att.
    spf = spfeat.reshape(N, H, W, 2)
    cols, _ = extract_patches(spf, 7, 1, 3)
    M = N * HW
    K = 7 * 7 * 2
    patches = jnp.pad(cols.reshape(M, K), ((0, 0), (0, 128 - K)))  # lane-dense
    wrow = jnp.pad(params["wsp"].reshape(1, K), ((0, 0), (0, 128 - K)))

    xflat = xca.reshape(M, C)
    tm = min(512, _round_up(M, 8))
    Mp = _round_up(M, tm)
    if Mp != M:
        patches = jnp.pad(patches, ((0, Mp - M), (0, 0)))
        xflat = jnp.pad(xflat, ((0, Mp - M), (0, 0)))

    out = pl.pallas_call(
        _spatial_apply_kernel,
        grid=(Mp // tm,),
        in_specs=[
            pl.BlockSpec((tm, 128), lambda i: (i, 0)),
            pl.BlockSpec((1, 128), lambda i: (0, 0)),
            pl.BlockSpec((tm, C), lambda i: (i, 0)),
        ],
        out_specs=pl.BlockSpec((tm, C), lambda i: (i, 0)),
        out_shape=jax.ShapeDtypeStruct((Mp, C), F32),
        compiler_params=pltpu.CompilerParams(
            dimension_semantics=("parallel",)),
    )(patches, wrow, xflat)
    return out[:M].reshape(N, H, W, C)


# --------------------------- parameters --------------------------------------

def _fold_bn(key, c):
    k1, k2, k3, k4 = jax.random.split(key, 4)
    gamma = jax.random.uniform(k1, (c,), F32, 0.5, 1.5)
    beta = jax.random.normal(k2, (c,), F32) * 0.1
    mean = jax.random.normal(k3, (c,), F32) * 0.1
    var = jax.random.uniform(k4, (c,), F32, 0.5, 1.5)
    scale = gamma / jnp.sqrt(var + 1e-5)
    bias = beta - mean * scale
    return scale[None, :], bias[None, :]


def _conv_w(key, cout, cin, k):
    fan_in = cin * k * k
    return jax.random.normal(key, (cout, cin, k, k), F32) * jnp.sqrt(2.0 / fan_in)


def init_params(key, num_classes=10):
    keys = iter(jax.random.split(key, 128))
    p = {"conv1_w": _conv_w(next(keys), 64, 3, 7),
         "bn1": _fold_bn(next(keys), 64)}

    def make_block(cin, cout, stride):
        blk = {
            "w1": _conv_w(next(keys), cout, cin, 3),
            "bn1": _fold_bn(next(keys), cout),
            "w2": _conv_w(next(keys), cout, cout, 3),
            "bn2": _fold_bn(next(keys), cout),
            "stride": stride,
        }
        if stride != 1 or cin != cout:
            blk["wd"] = _conv_w(next(keys), cout, cin, 1)
            blk["bnd"] = _fold_bn(next(keys), cout)
        return blk

    cfg = [(64, 64, 1), (64, 128, 2), (128, 256, 2), (256, 512, 2)]
    p["layers"] = [[make_block(cin, cout, s), make_block(cout, cout, 1)]
                   for cin, cout, s in cfg]

    def make_cbam(c, r=16):
        w1 = jax.random.normal(next(keys), (c, c // r), F32) * jnp.sqrt(2.0 / c)
        w2 = jax.random.normal(next(keys), (c // r, c), F32) * jnp.sqrt(2.0 / (c // r))
        wsp4 = _conv_w(next(keys), 1, 2, 7)
        wsp = jnp.transpose(wsp4, (2, 3, 1, 0)).reshape(7 * 7 * 2, 1)
        return {"w1": w1, "w2": w2, "wsp": wsp}

    p["cbam"] = [make_cbam(c) for c in (64, 128, 256, 512)]
    p["fc_w"] = jax.random.normal(next(keys), (num_classes, 512), F32) * 0.05
    p["fc_b"] = jax.random.normal(next(keys), (num_classes,), F32) * 0.05
    return p


# --------------------------- forward ------------------------------------------

def basic_block(x, blk):
    if "wd" in blk:
        idn = conv_bn_act(x, blk["wd"], *blk["bnd"],
                          stride=blk["stride"], pad=0, act=None)
    else:
        idn = x
    out = conv_bn_act(x, blk["w1"], *blk["bn1"],
                      stride=blk["stride"], pad=1, act="relu")
    # Residual add + ReLU fused into the second conv's GEMM epilogue.
    out = conv_bn_act(out, blk["w2"], *blk["bn2"], stride=1, pad=1,
                      act="relu", residual=idn)
    return out


def resnet_cbam_forward(x_nchw, p):
    x = jnp.transpose(x_nchw, (0, 2, 3, 1)).astype(F32)          # NCHW -> NHWC
    x = conv_bn_act(x, p["conv1_w"], *p["bn1"], stride=2, pad=3, act="relu")
    x = maxpool2d(x, k=3, stride=2, pad=1)
    for layer, cb in zip(p["layers"], p["cbam"]):
        for blk in layer:
            x = basic_block(x, blk)
        x = cbam(x, cb)
    # Global average pool (tiny reduction, plain-JAX glue), flatten, FC.
    feat = jnp.mean(x, axis=(1, 2))                               # (N, 512)
    logits = gemm_affine(feat, p["fc_w"].T,
                         jnp.ones((1, p["fc_w"].shape[0]), F32),
                         p["fc_b"][None, :], act=None)
    return logits


if __name__ == "__main__":
    key = jax.random.PRNGKey(0)
    pkey, xkey = jax.random.split(key)
    params = init_params(pkey, num_classes=10)
    # Small but structurally consistent input: batch=2, 3 channels, 32x32 (NCHW).
    x = jax.random.normal(xkey, (2, 3, 32, 32), F32)
    out = resnet_cbam_forward(x, params)
    jax.block_until_ready(out)
    assert out.shape == (2, 10)
    print("KERNEL_OK")
</pallas_src>

<mosaic_0001>
module attributes {stable_mosaic.version = 11 : i64} {
  func.func @_gemm_affine_kernel(%arg0: i32, %arg1: i32, %arg2: i32, %arg3: memref<256x256xbf16, #tpu.memory_space<vmem>>, %arg4: memref<256x64xbf16, #tpu.memory_space<vmem>>, %arg5: memref<1x64xf32, #tpu.memory_space<vmem>>, %arg6: memref<1x64xf32, #tpu.memory_space<vmem>>, %arg7: memref<256x64xf32, #tpu.memory_space<vmem>>, %arg8: memref<256x64xf32, #tpu.memory_space<vmem>>) attributes {dimension_semantics = [#tpu.dimension_semantics<parallel>, #tpu.dimension_semantics<parallel>, #tpu.dimension_semantics<arbitrary>], iteration_bounds = array<i64: 2, 1, 1>, scalar_prefetch = 0 : i64, scratch_operands = 1 : i64, tpu.core_type = #tpu.core_type<tc>, window_params = [{transform_indices = @transform_0, window_bounds = array<i64: 256, 256>}, {transform_indices = @transform_1, window_bounds = array<i64: 256, 64>}, {transform_indices = @transform_2, window_bounds = array<i64: 1, 64>}, {transform_indices = @transform_3, window_bounds = array<i64: 1, 64>}, {transform_indices = @transform_4, window_bounds = array<i64: 256, 64>}]} {
    %c0_i32 = arith.constant 0 : i32
    %0 = arith.cmpi eq, %arg2, %c0_i32 : i32
    %1 = arith.extui %0 : i1 to i32
    %c0_i32_0 = arith.constant 0 : i32
    %2 = arith.cmpi ne, %1, %c0_i32_0 : i32
    scf.if %2 {
      %cst_10 = arith.constant 0.000000e+00 : f32
      %12 = vector.broadcast %cst_10 : f32 to vector<256x64xf32>
      %c0_11 = arith.constant 0 : index
      %c0_12 = arith.constant 0 : index
      %13 = vector.load %arg8[%c0_11, %c0_12] : memref<256x64xf32, #tpu.memory_space<vmem>>, vector<256x64xf32>
      tpu.vector_store %arg8[%c0_11, %c0_12], %12 {strides = array<i32>} : memref<256x64xf32, #tpu.memory_space<vmem>>, vector<256x64xf32>,
    } else {
    }
    %c0 = arith.constant 0 : index
    %c0_1 = arith.constant 0 : index
    %3 = vector.load %arg8[%c0, %c0_1] : memref<256x64xf32, #tpu.memory_space<vmem>>, vector<256x64xf32>
    %c0_2 = arith.constant 0 : index
    %c0_3 = arith.constant 0 : index
    %4 = vector.load %arg3[%c0_2, %c0_3] : memref<256x256xbf16, #tpu.memory_space<vmem>>, vector<256x256xbf16>
    %c0_4 = arith.constant 0 : index
    %c0_5 = arith.constant 0 : index
    %5 = vector.load %arg4[%c0_4, %c0_5] : memref<256x64xbf16, #tpu.memory_space<vmem>>, vector<256x64xbf16>
    %cst = arith.constant dense<0.000000e+00> : vector<256x64xf32>
    %6 = tpu.matmul %4, %5, %cst {dimension_numbers = #tpu.dot_dimension_numbers<[1], [0], [0], [1], [0, 0, 1, 1], [], []>} : vector<256x256xbf16>, vector<256x64xbf16>, vector<256x64xf32> -> vector<256x64xf32>
    %7 = arith.addf %3, %6 : vector<256x64xf32>
    %c0_6 = arith.constant 0 : index
    %c0_7 = arith.constant 0 : index
    %8 = vector.load %arg8[%c0_6, %c0_7] : memref<256x64xf32, #tpu.memory_space<vmem>>, vector<256x64xf32>
    tpu.vector_store %arg8[%c0_6, %c0_7], %7 {strides = array<i32>} : memref<256x64xf32, #tpu.memory_space<vmem>>, vector<256x64xf32>,
    %c0_i32_8 = arith.constant 0 : i32
    %9 = arith.cmpi eq, %arg2, %c0_i32_8 : i32
    %10 = arith.extui %9 : i1 to i32
    %c0_i32_9 = arith.constant 0 : i32
    %11 = arith.cmpi ne, %10, %c0_i32_9 : i32
    scf.if %11 {
      %c0_10 = arith.constant 0 : index
      %c0_11 = arith.constant 0 : index
      %12 = vector.load %arg8[%c0_10, %c0_11] : memref<256x64xf32, #tpu.memory_space<vmem>>, vector<256x64xf32>
      %c0_12 = arith.constant 0 : index
      %c0_13 = arith.constant 0 : index
      %13 = vector.load %arg5[%c0_12, %c0_13] : memref<1x64xf32, #tpu.memory_space<vmem>>, vector<1x64xf32>
      %14 = vector.broadcast %13 : vector<1x64xf32> to vector<256x64xf32>
      %15 = arith.mulf %12, %14 : vector<256x64xf32>
      %c0_14 = arith.constant 0 : index
      %c0_15 = arith.constant 0 : index
      %16 = vector.load %arg6[%c0_14, %c0_15] : memref<1x64xf32, #tpu.memory_space<vmem>>, vector<1x64xf32>
      %17 = vector.broadcast %16 : vector<1x64xf32> to vector<256x64xf32>
      %18 = arith.addf %15, %17 : vector<256x64xf32>
      %cst_16 = arith.constant 0.000000e+00 : f32
      %19 = vector.broadcast %cst_16 : f32 to vector<256x64xf32>
      %20 = arith.maximumf %18, %19 : vector<256x64xf32>
      %c0_17 = arith.constant 0 : index
      %c0_18 = arith.constant 0 : index
      %21 = vector.load %arg7[%c0_17, %c0_18] : memref<256x64xf32, #tpu.memory_space<vmem>>, vector<256x64xf32>
      tpu.vector_store %arg7[%c0_17, %c0_18], %20 {strides = array<i32>} : memref<256x64xf32, #tpu.memory_space<vmem>>, vector<256x64xf32>,
    } else {
    }
    return
  }
  func.func @transform_0(%arg0: i32, %arg1: i32, %arg2: i32) -> (i32, i32) {
    %c0_i32 = arith.constant 0 : i32
    return %arg0, %arg2 : i32, i32
  }
  func.func @transform_1(%arg0: i32, %arg1: i32, %arg2: i32) -> (i32, i32) {
    %c0_i32 = arith.constant 0 : i32
    return %arg2, %arg1 : i32, i32
  }
  func.func @transform_2(%arg0: i32, %arg1: i32, %arg2: i32) -> (i32, i32) {
    %c0_i32 = arith.constant 0 : i32
    %c0_i32_0 = arith.constant 0 : i32
    return %c0_i32, %arg1 : i32, i32
  }
  func.func @transform_3(%arg0: i32, %arg1: i32, %arg2: i32) -> (i32, i32) {
    %c0_i32 = arith.constant 0 : i32
    %c0_i32_0 = arith.constant 0 : i32
    return %c0_i32, %arg1 : i32, i32
  }
  func.func @transform_4(%arg0: i32, %arg1: i32, %arg2: i32) -> (i32, i32) {
    %c0_i32 = arith.constant 0 : i32
    return %arg0, %arg1 : i32, i32
  }
}

</mosaic_0001>

<bundles_post_ra>
// kernel: tpu_custom_call.1
= control target key start
LH: loop header
LB: loop body
LE: loop exit
PB: predicated region body
PF: predicated region fallthrough
CT: control target
= control target key end

     0   :  { %9 = vsyncpa [#allocation4], 0  ;;  %s2053_s0 = inlined_call_operand.hbm [shape: bf16[512,256], index: 0, kind: input, shape index: {}]   ;;  %s2054_s1 = inlined_call_operand.vmem [shape: bf16[256,64], index: 1, kind: input, shape index: {}]   ;;  %s2055_s2 = inlined_call_operand.vmem [shape: f32[1,64], index: 2, kind: input, shape index: {}]   ;;  %s2056_s3 = inlined_call_operand.vmem [shape: f32[1,64], index: 3, kind: input, shape index: {}]   ;;  %s2057_s4 = inlined_call_operand.vmem [shape: f32[512,64], index: 4, kind: output, shape index: {}]  }
   0x1   :  { %11 = vsyncpa [#allocation4 + $0x1], 0  ;;  %s1669_s15 = smov 0   ;;  %s1671_s16 = smov 0  }
   0x2   :  { %s1673_s17 = smov 0   ;;  %s1675_s18 = smov 0  }
   0x3   :  { %s1677_s19 = smov 0   ;;  %s1679_s20 = smov 0  }
   0x4 LB: > { %s1241_s21 = sadd.s32 4294967295, %s1638_s20   ;;  %s36_s22 = sadd.s32 1, %s1634_s19  ;;  %s1638_s20 = sphi %s1679_s20, %s17_s20   ;;  %s1634_s19 = sphi %s1677_s19, %s2065_s19   ;;  %s1630_s18 = sphi %s1675_s18, %s2064_s18   ;;  %s1626_s17 = sphi %s1673_s17, %s2063_s17   ;;  %s1622_s16 = sphi %s1671_s16, %s2062_s16   ;;  %s1618_s15 = sphi %s1669_s15, %s2061_s15  }
   0x5   : > { %p38_p0 = scmp.ge.s32.totalorder %s36_s22, 2  ;;  %s45_s23 = sadd.s32 1, %s1626_s17 }
   0x6   : > { %p52_p1 = scmp.ne.s32.totalorder %s1626_s17, %s1622_s16  ;;  %p53_p2 = scmp.eq.s32.totalorder %s1638_s20, 0 }
   0x7   : > { %s2067_s22 = smov (%p38_p0, %s36_s22), 0  ;;  %p58_p4 = scmp.ne.s32.totalorder %s1622_s16, %s1618_s15 }
   0x8   : > { %p1705_p3 = por %p53_p2, %p52_p1  ;;  %s40_s25 = ssub.s32 %s1634_s19, %s2067_s22 }
   0x9   : > { %p59_p5 = scmp.eq.s32.totalorder %s1241_s21, 0  ;;  %p43_p6 = scmp.eq.s32.totalorder %s40_s25, 0 }
   0xa   : > { %p1444_p8 = scmp.lt.s32.totalorder %s1638_s20, 2  ;;  %s214_s28 = sand.u32 1, %s1626_s17  }
   0xb   : > { %p1712_p7 = por %p59_p5, %p58_p4  ;;  %s1309_s29 = sshll.u32 %s1634_s19, 12 }
   0xc   : > { %s1718_s27 = scalar_select %p43_p6, %s1626_s17, %s45_s23  }
   0xd   : > { %s1248_s30 = sshll.u32 %s214_s28, 8  ;;  %s227_s7 = scalar_lea.hbm %s2053_s0, %s1309_s29 }
   0xe   : > { %s218_s8 = scalar_lea.vmem [#allocation3], %s1248_s30  ;;  %p1727_p9 = pnand %p1444_p8, %p1705_p3 }
   0xf   : > { %s228_s9 = sshll.u32 %s218_s8, 4  ;;  %s215_s11 = scalar_lea.sflag [#allocation4], %s214_s28  ;;  %s229_s9 = int_to_ptr.vmem [resolvable:$true] %s228_s9 }
  0x10   : > { %p1562_p10 = pneg %p1727_p9  ;;  %s1573_s12 = scalar_lea.vmem %s229_s9, 4096 }
  0x11   : > { %p1574_p11 = scmp.ne.s32.totalorder %s229_s9, %s1573_s12  ;;  %s1640_s13 = smov [#allocation3]  }
  0x12   : > { %s1578_s14 = sshll.u32 %s1640_s13, 4  ;;  %s1579_s14 = int_to_ptr.vmem [resolvable:$false] %s1578_s14 }
  0x13   : > { %p1576_p12 = pnand %p1574_p11, %p1562_p10  ;;  %s1580_s15 = scalar_lea.vmem %s1579_s14, 8192 }
  0x14   : > { %p1581_p0 = scmp.lt.s32.totalorder %s229_s9, %s1579_s14  ;;  %p1582_p1 = scmp.lt.s32.totalorder %s1580_s15, %s1573_s12 }
  0x15   : > { %p1577_p13 = pneg %p1576_p12 }
  0x16   : > { %p1583_p2 = por %p1582_p1, %p1581_p0 }
  0x18   : > { %p1584_p3 = pnand %p1583_p2, %p1577_p13 }
  0x1a   : > { %1587 = shalt.err (!%p1584_p3)
}
  0x1b   : > { %s1641_s21 = smov 128   ;;  %s1642_s23 = smov 8  }
  0x1c   : > { %1443 = dma.hbm_to_vmem [thread:$0]  (!%p1727_p9), %s227_s7, 4096, %s229_s9, %s215_s11, %s1641_s21, %s1641_s21, %s1642_s23  }
  0x1d   : > { %p1252_p4 = scmp.ge.s32.totalorder %s1638_s20, 1  ;;  %p236_p5 = scmp.lt.s32.totalorder %s1638_s20, 3 }
  0x1f   : > { %p237_p6 = pnand %p1252_p4, %p236_p5 }
  0x20   : > { %s242_s24 = sand.u32 (!%p237_p6), 1, %s1622_s16  }
  0x21   : > { %240 = sbr.rel (%p237_p6) target bundleno = 347 (0x15b), region = 36  ;;  %s1253_s25 = sshll.u32 (!%p237_p6), %s242_s24, 8 }
  0x22   : > { %s243_s28 = scalar_lea.sflag (!%p237_p6), [#allocation4], %s242_s24  ;;  %s1738_s29 = scalar_lea.vmem (!%p237_p6), [#allocation3], %s1253_s25 }
  0x26   : > { %1613 = dma.done.wait (%p1712_p7), %s243_s28, 4096  }
  0x27   : > { %1615 = vsyncadd (%p1712_p7), %s243_s28, 4294963200  ;;  %v1496_v0 = vld [vmem:[%s2054_s1 + $0x78] sm:$0xff]   ;;  %v1498_v2 = vld [vmem:[%s2054_s1 + $0x70] sm:$0xff]   ;;  %vm319_vm0 = vcmask 523264   ;;  %v1643_v48 = vmov 0.0  }
  0x28   : > { %v1497_v1 = vld [vmem:[%s2054_s1 + $0x38] sm:$0xff]   ;;  %1310 = vmatprep.subr.bf16.mxu0 %v1496_v0  ;;  %1422 = vmatprep.subr.bf16.mxu1 %v1496_v0  ;;  %v1499_v3 = vld [vmem:[%s2054_s1 + $0x30] sm:$0xff]   ;;  %v1500_v4 = vld [vmem:[%s2054_s1 + $0x68] sm:$0xff]   ;;  %320 = vst.msk [vmem:[#allocation2] sm:$0xff] %vm319_vm0, %v1643_v48 }
  0x29   : > { %1311 = vmatpush3.bf16.msra.mxu0 %v1497_v1  ;;  %1430 = vmatpush3.bf16.msra.mxu1 %v1497_v1  ;;  %v1501_v5 = vld [vmem:[%s2054_s1 + $0x28] sm:$0xff]   ;;  %v1502_v6 = vld [vmem:[%s2054_s1 + $0x60] sm:$0xff]   ;;  %v1504_v8 = vld [vmem:[%s2054_s1 + $0x58] sm:$0xff]   ;;  %321 = vst.msk [vmem:[#allocation2 + $0x8] sm:$0xff] %vm319_vm0, %v1643_v48 }
  0x2a   : > { %1312 = vmatprep.subr.bf16.mxu0 %v1498_v2  ;;  %1423 = vmatprep.subr.bf16.mxu1 %v1498_v2  ;;  %v1503_v7 = vld [vmem:[%s2054_s1 + $0x20] sm:$0xff]   ;;  %v1505_v9 = vld [vmem:[%s2054_s1 + $0x18] sm:$0xff]   ;;  %v1506_v10 = vld [vmem:[%s2054_s1 + $0x50] sm:$0xff]   ;;  %322 = vst.msk [vmem:[#allocation2 + $0x10] sm:$0xff] %vm319_vm0, %v1643_v48 }
  0x2b   : > { %v1514_v11 = vld [vmem:[%s1738_s29 + $0x4] ss:$8 sps:$4 sm:$0xff]   ;;  %v1507_v13 = vld [vmem:[%s2054_s1 + $0x10] sm:$0xff]   ;;  %v1512_v18 = vld [vmem:[%s1738_s29] ss:$8 sps:$4 sm:$0xff]   ;;  %323 = vst.msk [vmem:[#allocation2 + $0x18] sm:$0xff] %vm319_vm0, %v1643_v48 }
  0x2c   : > { %v1517_v12 = vld [vmem:[%s1738_s29 + $0x84] ss:$8 sps:$4 sm:$0xff]   ;;  %736 = vmatprep.mubr.bf16.mxu0 %v1514_v11  ;;  %v1515_v19 = vld [vmem:[%s1738_s29 + $0x80] ss:$8 sps:$4 sm:$0xff]   ;;  %v1518_v20 = vld [vmem:[%s1738_s29 + $0x14] ss:$8 sps:$4 sm:$0xff]  }
  0x2d   : > { %1313 = vmatpush3.bf16.msra.mxu0 %v1499_v3  ;;  %1431 = vmatpush3.bf16.msra.mxu1 %v1499_v3  ;;  %v1508_v14 = vld [vmem:[%s2054_s1 + $0x48] sm:$0xff]   ;;  %v1510_v16 = vld [vmem:[%s2054_s1 + $0x40] sm:$0xff]   ;;  %v1520_v21 = vld [vmem:[%s1738_s29 + $0x94] ss:$8 sps:$4 sm:$0xff]   ;;  %324 = vst.msk [vmem:[#allocation2 + $0x20] sm:$0xff] %vm319_vm0, %v1643_v48 }
  0x2e   : > { %1314 = vmatprep.subr.bf16.mxu0 %v1500_v4  ;;  %1424 = vmatprep.subr.bf16.mxu1 %v1500_v4  ;;  %v1509_v15 = vld [vmem:[%s2054_s1 + $0x8] sm:$0xff]   ;;  %v1511_v17 = vld [vmem:[%s2054_s1] sm:$0xff]   ;;  %v1522_v22 = vld [vmem:[%s1738_s29 + $0x10] ss:$8 sps:$4 sm:$0xff]   ;;  %325 = vst.msk [vmem:[#allocation2 + $0x28] sm:$0xff] %vm319_vm0, %v1643_v48 }
  0x2f   : > { %800 = vmatprep.mubr.bf16.mxu1 %v1517_v12  ;;  %v1523_v23 = vld [vmem:[%s1738_s29 + $0x90] ss:$8 sps:$4 sm:$0xff]   ;;  %v1524_v24 = vld [vmem:[%s1738_s29 + $0x24] ss:$8 sps:$4 sm:$0xff]   ;;  %v1528_v26 = vld [vmem:[%s1738_s29 + $0x20] ss:$8 sps:$4 sm:$0xff]  }
  0x30   : > { %v1526_v25 = vld [vmem:[%s1738_s29 + $0xa4] ss:$8 sps:$4 sm:$0xff]   ;;  %v1529_v27 = vld [vmem:[%s1738_s29 + $0xa0] ss:$8 sps:$4 sm:$0xff]   ;;  %v1530_v28 = vld [vmem:[%s1738_s29 + $0x34] ss:$8 sps:$4 sm:$0xff]  }
  0x31   : > { %1315 = vmatpush3.bf16.msra.mxu0 %v1501_v5  ;;  %1432 = vmatpush3.bf16.msra.mxu1 %v1501_v5  ;;  %v1532_v29 = vld [vmem:[%s1738_s29 + $0xb4] ss:$8 sps:$4 sm:$0xff]   ;;  %v1534_v30 = vld [vmem:[%s1738_s29 + $0x30] ss:$8 sps:$4 sm:$0xff]   ;;  %v1536_v32 = vld [vmem:[%s1738_s29 + $0x44] ss:$8 sps:$4 sm:$0xff]  }
  0x32   : > { %1316 = vmatprep.subr.bf16.mxu0 %v1502_v6  ;;  %1425 = vmatprep.subr.bf16.mxu1 %v1502_v6  ;;  %v1535_v31 = vld [vmem:[%s1738_s29 + $0xb0] ss:$8 sps:$4 sm:$0xff]   ;;  %v1538_v33 = vld [vmem:[%s1738_s29 + $0xc4] ss:$8 sps:$4 sm:$0xff]   ;;  %v1540_v34 = vld [vmem:[%s1738_s29 + $0x40] ss:$8 sps:$4 sm:$0xff]  }
  0x33   : > { %v1541_v35 = vld [vmem:[%s1738_s29 + $0xc0] ss:$8 sps:$4 sm:$0xff]   ;;  %v1542_v36 = vld [vmem:[%s1738_s29 + $0x54] ss:$8 sps:$4 sm:$0xff]   ;;  %v1546_v38 = vld [vmem:[%s1738_s29 + $0x50] ss:$8 sps:$4 sm:$0xff]  }
  0x34   : > { %v1544_v37 = vld [vmem:[%s1738_s29 + $0xd4] ss:$8 sps:$4 sm:$0xff]   ;;  %v1547_v39 = vld [vmem:[%s1738_s29 + $0xd0] ss:$8 sps:$4 sm:$0xff]   ;;  %v1548_v40 = vld [vmem:[%s1738_s29 + $0x64] ss:$8 sps:$4 sm:$0xff]  }
  0x35   : > { %1317 = vmatpush3.bf16.msra.mxu0 %v1503_v7  ;;  %1433 = vmatpush3.bf16.msra.mxu1 %v1503_v7  ;;  %v1550_v41 = vld [vmem:[%s1738_s29 + $0xe4] ss:$8 sps:$4 sm:$0xff]   ;;  %v1552_v42 = vld [vmem:[%s1738_s29 + $0x60] ss:$8 sps:$4 sm:$0xff]   ;;  %v1554_v44 = vld [vmem:[%s1738_s29 + $0x74] ss:$8 sps:$4 sm:$0xff]  }
  0x36   : > { %1318 = vmatprep.subr.bf16.mxu0 %v1504_v8  ;;  %1426 = vmatprep.subr.bf16.mxu1 %v1504_v8  ;;  %v1553_v43 = vld [vmem:[%s1738_s29 + $0xe0] ss:$8 sps:$4 sm:$0xff]   ;;  %v1556_v45 = vld [vmem:[%s1738_s29 + $0xf4] ss:$8 sps:$4 sm:$0xff]   ;;  %v1558_v46 = vld [vmem:[%s1738_s29 + $0x70] ss:$8 sps:$4 sm:$0xff]  }
  0x37   : > { %v1559_v47 = vld [vmem:[%s1738_s29 + $0xf0] ss:$8 sps:$4 sm:$0xff]   ;;  %326 = vst.msk [vmem:[#allocation2 + $0x30] sm:$0xff] %vm319_vm0, %v1643_v48  ;;  %327 = vst.msk [vmem:[#allocation2 + $0x38] sm:$0xff] %vm319_vm0, %v1643_v48  ;;  %v352_v51 = vld [vmem:[#allocation2] sm:$0xff]  ;;  %s1254_s29 = sshll.u32 %s1630_s18, 5 }
  0x38   : > { %328 = vst.msk [vmem:[#allocation2 + $0x40] sm:$0xff] %vm319_vm0, %v1643_v48  ;;  %329 = vst.msk [vmem:[#allocation2 + $0x48] sm:$0xff] %vm319_vm0, %v1643_v48  ;;  %v353_v61 = vld [vmem:[#allocation2 + $0x8] sm:$0xff]  ;;  %p306_p7 = scmp.lt.s32.totalorder %s1254_s29, 63  ;;  %v354_v7 = vld [vmem:[#allocation2 + $0x10] sm:$0xff] }
  0x39   : > { %1319 = vmatpush3.bf16.msra.mxu0 %v1505_v9  ;;  %1434 = vmatpush3.bf16.msra.mxu1 %v1505_v9  ;;  %330 = vst.msk [vmem:[#allocation2 + $0x50] sm:$0xff] %vm319_vm0, %v1643_v48  ;;  %331 = vst.msk [vmem:[#allocation2 + $0x58] sm:$0xff] %vm319_vm0, %v1643_v48 }
  0x3a   : > { %1320 = vmatprep.subr.bf16.mxu0 %v1506_v10  ;;  %1427 = vmatprep.subr.bf16.mxu1 %v1506_v10  ;;  %332 = vst.msk [vmem:[#allocation2 + $0x60] sm:$0xff] %vm319_vm0, %v1643_v48  ;;  %333 = vst.msk [vmem:[#allocation2 + $0x68] sm:$0xff] %vm319_vm0, %v1643_v48  ;;  %s2069_s29 = smov (!%p306_p7, %s1254_s29), 63 }
  0x3b   : > { %334 = vst.msk [vmem:[#allocation2 + $0x70] sm:$0xff] %vm319_vm0, %v1643_v48  ;;  %335 = vst.msk [vmem:[#allocation2 + $0x78] sm:$0xff] %vm319_vm0, %v1643_v48  ;;  %s1255_s28 = sshll.u32 %s2069_s29, 3 }
  0x3c   : > { %336 = vst.msk [vmem:[#allocation2 + $0x80] sm:$0xff] %vm319_vm0, %v1643_v48  ;;  %337 = vst.msk [vmem:[#allocation2 + $0x88] sm:$0xff] %vm319_vm0, %v1643_v48  ;;  %s1883_s6 = scalar_lea.vmem %s2057_s4, %s1255_s28 }
  0x3d   : > { %1321 = vmatpush3.bf16.msra.mxu0 %v1507_v13  ;;  %1435 = vmatpush3.bf16.msra.mxu1 %v1507_v13  ;;  %338 = vst.msk [vmem:[#allocation2 + $0x90] sm:$0xff] %vm319_vm0, %v1643_v48  ;;  %339 = vst.msk [vmem:[#allocation2 + $0x98] sm:$0xff] %vm319_vm0, %v1643_v48  ;;  %v1866_v13 = vld [vmem:[%s2055_s2] ss:$0 sm:$0xff] }
  0x3e   : > { %1322 = vmatprep.subr.bf16.mxu0 %v1508_v14  ;;  %1428 = vmatprep.subr.bf16.mxu1 %v1508_v14  ;;  %340 = vst.msk [vmem:[#allocation2 + $0xa0] sm:$0xff] %vm319_vm0, %v1643_v48  ;;  %341 = vst.msk [vmem:[#allocation2 + $0xa8] sm:$0xff] %vm319_vm0, %v1643_v48 }
  0x3f   : > { %342 = vst.msk [vmem:[#allocation2 + $0xb0] sm:$0xff] %vm319_vm0, %v1643_v48  ;;  %343 = vst.msk [vmem:[#allocation2 + $0xb8] sm:$0xff] %vm319_vm0, %v1643_v48 }
  0x40   : > { %344 = vst.msk [vmem:[#allocation2 + $0xc0] sm:$0xff] %vm319_vm0, %v1643_v48  ;;  %345 = vst.msk [vmem:[#allocation2 + $0xc8] sm:$0xff] %vm319_vm0, %v1643_v48 }
  0x41   : > { %1323 = vmatpush3.bf16.msra.mxu0 %v1509_v15  ;;  %1436 = vmatpush3.bf16.msra.mxu1 %v1509_v15  ;;  %346 = vst.msk [vmem:[#allocation2 + $0xd0] sm:$0xff] %vm319_vm0, %v1643_v48  ;;  %347 = vst.msk [vmem:[#allocation2 + $0xd8] sm:$0xff] %vm319_vm0, %v1643_v48 }
  0x42   : > { %1324 = vmatprep.subr.bf16.mxu0 %v1510_v16  ;;  %1429 = vmatprep.subr.bf16.mxu1 %v1510_v16  ;;  %348 = vst.msk [vmem:[#allocation2 + $0xe0] sm:$0xff] %vm319_vm0, %v1643_v48  ;;  %349 = vst.msk [vmem:[#allocation2 + $0xe8] sm:$0xff] %vm319_vm0, %v1643_v48  ;;  %v1871_v16 = vld [vmem:[%s2056_s3] ss:$0 sm:$0xff] }
  0x43   : > { %350 = vst.msk [vmem:[#allocation2 + $0xf0] sm:$0xff] %vm319_vm0, %v1643_v48  ;;  %351 = vst.msk [vmem:[#allocation2 + $0xf8] sm:$0xff] %vm319_vm0, %v1643_v48  ;;  %v368_v53 = vld [vmem:[#allocation2 + $0x80] sm:$0xff]  ;;  %v369_v63 = vld [vmem:[#allocation2 + $0x88] sm:$0xff] }
  0x44   : > { %v370_v9 = vld [vmem:[#allocation2 + $0x90] sm:$0xff] }
  0x45   : > { %1325 = vmatpush3.bf16.msra.mxu0 %v1511_v17  ;;  %1437 = vmatpush3.bf16.msra.mxu1 %v1511_v17 }
  0x48   : > { %737 = vmatmul.mubr.bf16.vlgmr.msra.gmra.mxu0 %v1512_v18  ;;  %801 = vmatmul.mubr.bf16.vlgmr.msra.gmra.mxu1 %v1515_v19  ;;  %v355_v19 = vld [vmem:[#allocation2 + $0x18] sm:$0xff] }
  0x49   : > { %744 = vmatprep.mubr.bf16.mxu0 %v1518_v20  ;;  %808 = vmatprep.mubr.bf16.mxu1 %v1520_v21 }
  0x50   : > { %745 = vmatmul.mubr.bf16.gmra.mxu0 %v1522_v22  ;;  %809 = vmatmul.mubr.bf16.gmra.mxu1 %v1523_v23  ;;  %v371_v23 = vld [vmem:[#allocation2 + $0x98] sm:$0xff] }
  0x51   : > { %752 = vmatprep.mubr.bf16.mxu0 %v1524_v24  ;;  %816 = vmatprep.mubr.bf16.mxu1 %v1526_v25 }
  0x58   : > { %753 = vmatmul.mubr.bf16.gmra.mxu0 %v1528_v26  ;;  %817 = vmatmul.mubr.bf16.gmra.mxu1 %v1529_v27 }
  0x59   : > { %760 = vmatprep.mubr.bf16.mxu0 %v1530_v28  ;;  %824 = vmatprep.mubr.bf16.mxu1 %v1532_v29 }
  0x60   : > { %761 = vmatmul.mubr.bf16.gmra.mxu0 %v1534_v30  ;;  %825 = vmatmul.mubr.bf16.gmra.mxu1 %v1535_v31 }
  0x61   : > { %768 = vmatprep.mubr.bf16.mxu0 %v1536_v32  ;;  %832 = vmatprep.mubr.bf16.mxu1 %v1538_v33 }
  0x68   : > { %769 = vmatmul.mubr.bf16.gmra.mxu0 %v1540_v34  ;;  %833 = vmatmul.mubr.bf16.gmra.mxu1 %v1541_v35 }
  0x69   : > { %776 = vmatprep.mubr.bf16.mxu0 %v1542_v36  ;;  %840 = vmatprep.mubr.bf16.mxu1 %v1544_v37 }
  0x70   : > { %777 = vmatmul.mubr.bf16.gmra.mxu0 %v1546_v38  ;;  %841 = vmatmul.mubr.bf16.gmra.mxu1 %v1547_v39 }
  0x71   : > { %784 = vmatprep.mubr.bf16.mxu0 %v1548_v40  ;;  %848 = vmatprep.mubr.bf16.mxu1 %v1550_v41 }
  0x78   : > { %785 = vmatmul.mubr.bf16.gmra.mxu0 %v1552_v42  ;;  %849 = vmatmul.mubr.bf16.gmra.mxu1 %v1553_v43  ;;  %v356_v43 = vld [vmem:[#allocation2 + $0x20] sm:$0xff] }
  0x79   : > { %792 = vmatprep.mubr.bf16.mxu0 %v1554_v44  ;;  %856 = vmatprep.mubr.bf16.mxu1 %v1556_v45  ;;  %v372_v44 = vld [vmem:[#allocation2 + $0xa0] sm:$0xff] }
  0x80   : > { %793 = vmatmul.mubr.bf16.gmra.mxu0 %v1558_v46  ;;  %857 = vmatmul.mubr.bf16.gmra.mxu1 %v1559_v47 }
 0x108   : > { %v1326_v49 = vpop.f32.mrf.mxu0  ;;  %v1374_v50 = vpop.f32.mrf.mxu1 }
 0x10a   : > { %v1327_v52 = vpop.f32.mrf.mxu0  ;;  %v1375_v54 = vpop.f32.mrf.mxu1 }
 0x10b   : > { %v1328_v55 = vadd.f32 %v1327_v52, %v1326_v49  ;;  %v1376_v56 = vadd.f32 %v1375_v54, %v1374_v50 }
 0x10c   : > { %v1329_v57 = vpop.f32.mrf.mxu0  ;;  %v1377_v58 = vpop.f32.mrf.mxu1 }
 0x10d   : > { %v865_v59 = vadd.f32 %v1328_v55, %v352_v51  ;;  %v881_v60 = vadd.f32 %v1376_v56, %v368_v53 }
 0x10e   : > { %v1330_v62 = vpop.f32.mrf.mxu0  ;;  %v1378_v0 = vpop.f32.mrf.mxu1 }
 0x10f   : > { %898 = vst.msk [vmem:[#allocation2] sm:$0xff] %vm319_vm0, %v865_v59  ;;  %914 = vst.msk [vmem:[#allocation2 + $0x80] sm:$0xff] %vm319_vm0, %v881_v60  ;;  %v1331_v1 = vadd.f32 %v1330_v62, %v1329_v57  ;;  %v1379_v2 = vadd.f32 %v1378_v0, %v1377_v58  ;;  %v373_v62 = vld [vmem:[#allocation2 + $0xa8] sm:$0xff] }
 0x110   : > { %v1332_v3 = vpop.f32.mrf.mxu0  ;;  %v1380_v4 = vpop.f32.mrf.mxu1 }
 0x111   : > { %v866_v5 = vadd.f32 %v1331_v1, %v353_v61  ;;  %v882_v6 = vadd.f32 %v1379_v2, %v369_v63  ;;  %v357_v61 = vld [vmem:[#allocation2 + $0x28] sm:$0xff] }
 0x112   : > { %v1333_v8 = vpop.f32.mrf.mxu0  ;;  %v1381_v10 = vpop.f32.mrf.mxu1 }
 0x113   : > { %899 = vst.msk [vmem:[#allocation2 + $0x8] sm:$0xff] %vm319_vm0, %v866_v5  ;;  %915 = vst.msk [vmem:[#allocation2 + $0x88] sm:$0xff] %vm319_vm0, %v882_v6  ;;  %v1334_v11 = vadd.f32 %v1333_v8, %v1332_v3  ;;  %v1382_v12 = vadd.f32 %v1381_v10, %v1380_v4 }
 0x114   : > { %v1335_v14 = vpop.f32.mrf.mxu0  ;;  %v1383_v15 = vpop.f32.mrf.mxu1 }
 0x115   : > { %v867_v17 = vadd.f32 %v1334_v11, %v354_v7  ;;  %v883_v18 = vadd.f32 %v1382_v12, %v370_v9 }
 0x116   : > { %v933_v20 = vld [vmem:[#allocation2] sm:$0xff]  ;;  %v1336_v22 = vpop.f32.mrf.mxu0  ;;  %v1384_v24 = vpop.f32.mrf.mxu1 }
 0x117   : > { %v949_v21 = vld [vmem:[#allocation2 + $0x80] sm:$0xff]  ;;  %v972_v25 = vmul.f32 %v1866_v13, %v933_v20  ;;  %900 = vst.msk [vmem:[#allocation2 + $0x10] sm:$0xff] %vm319_vm0, %v867_v17  ;;  %916 = vst.msk [vmem:[#allocation2 + $0x90] sm:$0xff] %vm319_vm0, %v883_v18  ;;  %v1337_v27 = vadd.f32 %v1336_v22, %v1335_v14  ;;  %v1385_v28 = vadd.f32 %v1384_v24, %v1383_v15  ;;  %v358_v17 = vld [vmem:[#allocation2 + $0x30] sm:$0xff] }
 0x118   : > { %v988_v26 = vmul.f32 %v1866_v13, %v949_v21  ;;  %v1338_v29 = vpop.f32.mrf.mxu0  ;;  %v1386_v30 = vpop.f32.mrf.mxu1  ;;  %v374_v18 = vld [vmem:[#allocation2 + $0xb0] sm:$0xff] }
 0x119   : > { %v1011_v31 = vadd.f32 %v1871_v16, %v972_v25  ;;  %v868_v33 = vadd.f32 %v1337_v27, %v355_v19  ;;  %v884_v34 = vadd.f32 %v1385_v28, %v371_v23  ;;  %v359_v27 = vld [vmem:[#allocation2 + $0x38] sm:$0xff] }
 0x11a   : > { %v1027_v32 = vadd.f32 %v1871_v16, %v988_v26  ;;  %v934_v35 = vld [vmem:[#allocation2 + $0x8] sm:$0xff]  ;;  %v1339_v37 = vpop.f32.mrf.mxu0  ;;  %v1387_v38 = vpop.f32.mrf.mxu1 }
 0x11b   : > { %v950_v36 = vld [vmem:[#allocation2 + $0x88] sm:$0xff]  ;;  %v1043_v39 = vmax.f32 %v1011_v31, 0.0  ;;  %v973_v41 = vmul.f32 %v1866_v13, %v934_v35  ;;  %901 = vst.msk [vmem:[#allocation2 + $0x18] sm:$0xff] %vm319_vm0, %v868_v33  ;;  %917 = vst.msk [vmem:[#allocation2 + $0x98] sm:$0xff] %vm319_vm0, %v884_v34  ;;  %v1340_v45 = vadd.f32 %v1339_v37, %v1338_v29  ;;  %v1388_v46 = vadd.f32 %v1387_v38, %v1386_v30  ;;  %v375_v29 = vld [vmem:[#allocation2 + $0xb8] sm:$0xff] }
 0x11c   : > { %v1059_v40 = vmax.f32 %v1027_v32, 0.0  ;;  %v989_v42 = vmul.f32 %v1866_v13, %v950_v36  ;;  %v1341_v47 = vpop.f32.mrf.mxu0  ;;  %v1389_v48 = vpop.f32.mrf.mxu1 }
 0x11d   : > { %1075 = vst.msk [vmem:[%s1883_s6] sm:$0xff] %vm319_vm0, %v1043_v39  ;;  %v1012_v49 = vadd.f32 %v1871_v16, %v973_v41  ;;  %v869_v53 = vadd.f32 %v1340_v45, %v356_v43  ;;  %v885_v54 = vadd.f32 %v1388_v46, %v372_v44  ;;  %v360_v45 = vld [vmem:[#allocation2 + $0x40] sm:$0xff] }
 0x11e   : > { %1091 = vst.msk [vmem:[%s1883_s6 + $0x80] sm:$0xff] %vm319_vm0, %v1059_v40  ;;  %v1028_v50 = vadd.f32 %v1871_v16, %v989_v42  ;;  %v935_v51 = vld [vmem:[#allocation2 + $0x10] sm:$0xff]  ;;  %v1342_v55 = vpop.f32.mrf.mxu0  ;;  %v1390_v56 = vpop.f32.mrf.mxu1 }
 0x11f   : > { %v951_v52 = vld [vmem:[#allocation2 + $0x90] sm:$0xff]  ;;  %v1044_v57 = vmax.f32 %v1012_v49, 0.0  ;;  %v974_v59 = vmul.f32 %v1866_v13, %v935_v51  ;;  %902 = vst.msk [vmem:[#allocation2 + $0x20] sm:$0xff] %vm319_vm0, %v869_v53  ;;  %918 = vst.msk [vmem:[#allocation2 + $0xa0] sm:$0xff] %vm319_vm0, %v885_v54  ;;  %v1343_v63 = vadd.f32 %v1342_v55, %v1341_v47  ;;  %v1391_v0 = vadd.f32 %v1390_v56, %v1389_v48  ;;  %v376_v47 = vld [vmem:[#allocation2 + $0xc0] sm:$0xff] }
 0x120   : > { %v1060_v58 = vmax.f32 %v1028_v50, 0.0  ;;  %v990_v60 = vmul.f32 %v1866_v13, %v951_v52  ;;  %v1344_v1 = vpop.f32.mrf.mxu0  ;;  %v1392_v2 = vpop.f32.mrf.mxu1 }
 0x121   : > { %1076 = vst.msk [vmem:[%s1883_s6 + $0x8] sm:$0xff] %vm319_vm0, %v1044_v57  ;;  %v1013_v3 = vadd.f32 %v1871_v16, %v974_v59  ;;  %v870_v7 = vadd.f32 %v1343_v63, %v357_v61  ;;  %v886_v8 = vadd.f32 %v1391_v0, %v373_v62  ;;  %v361_v63 = vld [vmem:[#allocation2 + $0x48] sm:$0xff] }
 0x122   : > { %1092 = vst.msk [vmem:[%s1883_s6 + $0x88] sm:$0xff] %vm319_vm0, %v1060_v58  ;;  %v1029_v4 = vadd.f32 %v1871_v16, %v990_v60  ;;  %v936_v5 = vld [vmem:[#allocation2 + $0x18] sm:$0xff]  ;;  %v1345_v9 = vpop.f32.mrf.mxu0  ;;  %v1393_v10 = vpop.f32.mrf.mxu1 }
 0x123   : > { %v952_v6 = vld [vmem:[#allocation2 + $0x98] sm:$0xff]  ;;  %v1045_v11 = vmax.f32 %v1013_v3, 0.0  ;;  %v975_v14 = vmul.f32 %v1866_v13, %v936_v5  ;;  %903 = vst.msk [vmem:[#allocation2 + $0x28] sm:$0xff] %vm319_vm0, %v870_v7  ;;  %919 = vst.msk [vmem:[#allocation2 + $0xa8] sm:$0xff] %vm319_vm0, %v886_v8  ;;  %v1346_v19 = vadd.f32 %v1345_v9, %v1344_v1  ;;  %v1394_v20 = vadd.f32 %v1393_v10, %v1392_v2  ;;  %v377_v1 = vld [vmem:[#allocation2 + $0xc8] sm:$0xff] }
 0x124   : > { %v1061_v12 = vmax.f32 %v1029_v4, 0.0  ;;  %v991_v15 = vmul.f32 %v1866_v13, %v952_v6  ;;  %v1347_v21 = vpop.f32.mrf.mxu0  ;;  %v1395_v22 = vpop.f32.mrf.mxu1 }
 0x125   : > { %1077 = vst.msk [vmem:[%s1883_s6 + $0x10] sm:$0xff] %vm319_vm0, %v1045_v11  ;;  %v1014_v23 = vadd.f32 %v1871_v16, %v975_v14  ;;  %v871_v25 = vadd.f32 %v1346_v19, %v358_v17  ;;  %v887_v26 = vadd.f32 %v1394_v20, %v374_v18  ;;  %v362_v17 = vld [vmem:[#allocation2 + $0x50] sm:$0xff] }
 0x126   : > { %1093 = vst.msk [vmem:[%s1883_s6 + $0x90] sm:$0xff] %vm319_vm0, %v1061_v12  ;;  %v1030_v24 = vadd.f32 %v1871_v16, %v991_v15  ;;  %v1348_v28 = vpop.f32.mrf.mxu0  ;;  %v1396_v30 = vpop.f32.mrf.mxu1  ;;  %v937_v33 = vld [vmem:[#allocation2 + $0x20] sm:$0xff] }
 0x127   : > { %v1046_v31 = vmax.f32 %v1014_v23, 0.0  ;;  %v953_v34 = vld [vmem:[#allocation2 + $0xa0] sm:$0xff]  ;;  %v1349_v35 = vadd.f32 %v1348_v28, %v1347_v21  ;;  %v1397_v36 = vadd.f32 %v1396_v30, %v1395_v22  ;;  %v976_v37 = vmul.f32 %v1866_v13, %v937_v33  ;;  %904 = vst.msk [vmem:[#allocation2 + $0x30] sm:$0xff] %vm319_vm0, %v871_v25  ;;  %920 = vst.msk [vmem:[#allocation2 + $0xb0] sm:$0xff] %vm319_vm0, %v887_v26  ;;  %v378_v23 = vld [vmem:[#allocation2 + $0xd0] sm:$0xff] }
 0x128   : > { %v1062_v32 = vmax.f32 %v1030_v24, 0.0  ;;  %v992_v38 = vmul.f32 %v1866_v13, %v953_v34  ;;  %v1350_v39 = vpop.f32.mrf.mxu0  ;;  %v1398_v40 = vpop.f32.mrf.mxu1 }
 0x129   : > { %1078 = vst.msk [vmem:[%s1883_s6 + $0x18] sm:$0xff] %vm319_vm0, %v1046_v31  ;;  %v872_v41 = vadd.f32 %v1349_v35, %v359_v27  ;;  %v888_v42 = vadd.f32 %v1397_v36, %v375_v29  ;;  %v1015_v43 = vadd.f32 %v1871_v16, %v976_v37 }
 0x12a   : > { %1094 = vst.msk [vmem:[%s1883_s6 + $0x98] sm:$0xff] %vm319_vm0, %v1062_v32  ;;  %v1031_v44 = vadd.f32 %v1871_v16, %v992_v38  ;;  %v1351_v46 = vpop.f32.mrf.mxu0  ;;  %v1399_v48 = vpop.f32.mrf.mxu1  ;;  %v938_v49 = vld [vmem:[#allocation2 + $0x28] sm:$0xff] }
 0x12b   : > { %v954_v50 = vld [vmem:[#allocation2 + $0xa8] sm:$0xff]  ;;  %905 = vst.msk [vmem:[#allocation2 + $0x38] sm:$0xff] %vm319_vm0, %v872_v41  ;;  %921 = vst.msk [vmem:[#allocation2 + $0xb8] sm:$0xff] %vm319_vm0, %v888_v42  ;;  %v1352_v51 = vadd.f32 %v1351_v46, %v1350_v39  ;;  %v1400_v52 = vadd.f32 %v1399_v48, %v1398_v40  ;;  %v1047_v53 = vmax.f32 %v1015_v43, 0.0  ;;  %v977_v55 = vmul.f32 %v1866_v13, %v938_v49  ;;  %v379_v46 = vld [vmem:[#allocation2 + $0xd8] sm:$0xff] }
 0x12c   : > { %v1063_v54 = vmax.f32 %v1031_v44, 0.0  ;;  %v993_v56 = vmul.f32 %v1866_v13, %v954_v50  ;;  %v1353_v57 = vpop.f32.mrf.mxu0  ;;  %v1401_v58 = vpop.f32.mrf.mxu1 }
 0x12d   : > { %v873_v59 = vadd.f32 %v1352_v51, %v360_v45  ;;  %v889_v60 = vadd.f32 %v1400_v52, %v376_v47  ;;  %1079 = vst.msk [vmem:[%s1883_s6 + $0x20] sm:$0xff] %vm319_vm0, %v1047_v53  ;;  %v1016_v61 = vadd.f32 %v1871_v16, %v977_v55  ;;  %v363_v45 = vld [vmem:[#allocation2 + $0x58] sm:$0xff] }
 0x12e   : > { %1095 = vst.msk [vmem:[%s1883_s6 + $0xa0] sm:$0xff] %vm319_vm0, %v1063_v54  ;;  %v1032_v62 = vadd.f32 %v1871_v16, %v993_v56  ;;  %v1354_v0 = vpop.f32.mrf.mxu0  ;;  %v1402_v2 = vpop.f32.mrf.mxu1  ;;  %v939_v3 = vld [vmem:[#allocation2 + $0x30] sm:$0xff] }
 0x12f   : > { %v955_v4 = vld [vmem:[#allocation2 + $0xb0] sm:$0xff]  ;;  %906 = vst.msk [vmem:[#allocation2 + $0x40] sm:$0xff] %vm319_vm0, %v873_v59  ;;  %922 = vst.msk [vmem:[#allocation2 + $0xc0] sm:$0xff] %vm319_vm0, %v889_v60  ;;  %v1355_v5 = vadd.f32 %v1354_v0, %v1353_v57  ;;  %v1403_v6 = vadd.f32 %v1402_v2, %v1401_v58  ;;  %v1048_v7 = vmax.f32 %v1016_v61, 0.0  ;;  %v978_v9 = vmul.f32 %v1866_v13, %v939_v3  ;;  %v380_v0 = vld [vmem:[#allocation2 + $0xe0] sm:$0xff] }
 0x130   : > { %v1064_v8 = vmax.f32 %v1032_v62, 0.0  ;;  %v994_v10 = vmul.f32 %v1866_v13, %v955_v4  ;;  %v1356_v11 = vpop.f32.mrf.mxu0  ;;  %v1404_v12 = vpop.f32.mrf.mxu1 }
 0x131   : > { %v874_v14 = vadd.f32 %v1355_v5, %v361_v63  ;;  %v890_v15 = vadd.f32 %v1403_v6, %v377_v1  ;;  %1080 = vst.msk [vmem:[%s1883_s6 + $0x28] sm:$0xff] %vm319_vm0, %v1048_v7  ;;  %v1017_v18 = vadd.f32 %v1871_v16, %v978_v9  ;;  %v364_v63 = vld [vmem:[#allocation2 + $0x60] sm:$0xff] }
 0x132   : > { %1096 = vst.msk [vmem:[%s1883_s6 + $0xa8] sm:$0xff] %vm319_vm0, %v1064_v8  ;;  %v1033_v19 = vadd.f32 %v1871_v16, %v994_v10  ;;  %v940_v20 = vld [vmem:[#allocation2 + $0x38] sm:$0xff]  ;;  %v1357_v22 = vpop.f32.mrf.mxu0  ;;  %v1405_v24 = vpop.f32.mrf.mxu1 }
 0x133   : > { %v956_v21 = vld [vmem:[#allocation2 + $0xb8] sm:$0xff]  ;;  %v979_v25 = vmul.f32 %v1866_v13, %v940_v20  ;;  %907 = vst.msk [vmem:[#allocation2 + $0x48] sm:$0xff] %vm319_vm0, %v874_v14  ;;  %923 = vst.msk [vmem:[#allocation2 + $0xc8] sm:$0xff] %vm319_vm0, %v890_v15  ;;  %v1358_v27 = vadd.f32 %v1357_v22, %v1356_v11  ;;  %v1406_v28 = vadd.f32 %v1405_v24, %v1404_v12  ;;  %v1049_v29 = vmax.f32 %v1017_v18, 0.0  ;;  %v381_v20 = vld [vmem:[#allocation2 + $0xe8] sm:$0xff] }
 0x134   : > { %v995_v26 = vmul.f32 %v1866_v13, %v956_v21  ;;  %v1065_v30 = vmax.f32 %v1033_v19, 0.0  ;;  %v1359_v31 = vpop.f32.mrf.mxu0  ;;  %v1407_v32 = vpop.f32.mrf.mxu1  ;;  %v365_v19 = vld [vmem:[#allocation2 + $0x68] sm:$0xff] }
 0x135   : > { %v1018_v33 = vadd.f32 %v1871_v16, %v979_v25  ;;  %v875_v35 = vadd.f32 %v1358_v27, %v362_v17  ;;  %v891_v36 = vadd.f32 %v1406_v28, %v378_v23  ;;  %1081 = vst.msk [vmem:[%s1883_s6 + $0x30] sm:$0xff] %vm319_vm0, %v1049_v29  ;;  %v366_v29 = vld [vmem:[#allocation2 + $0x70] sm:$0xff] }
 0x136   : > { %v1034_v34 = vadd.f32 %v1871_v16, %v995_v26  ;;  %1097 = vst.msk [vmem:[%s1883_s6 + $0xb0] sm:$0xff] %vm319_vm0, %v1065_v30  ;;  %v941_v37 = vld [vmem:[#allocation2 + $0x40] sm:$0xff]  ;;  %v1360_v39 = vpop.f32.mrf.mxu0  ;;  %v1408_v40 = vpop.f32.mrf.mxu1 }
 0x137   : > { %v957_v38 = vld [vmem:[#allocation2 + $0xc0] sm:$0xff]  ;;  %v1050_v41 = vmax.f32 %v1018_v33, 0.0  ;;  %v980_v43 = vmul.f32 %v1866_v13, %v941_v37  ;;  %908 = vst.msk [vmem:[#allocation2 + $0x50] sm:$0xff] %vm319_vm0, %v875_v35  ;;  %924 = vst.msk [vmem:[#allocation2 + $0xd0] sm:$0xff] %vm319_vm0, %v891_v36  ;;  %v1361_v47 = vadd.f32 %v1360_v39, %v1359_v31  ;;  %v1409_v48 = vadd.f32 %v1408_v40, %v1407_v32  ;;  %v382_v31 = vld [vmem:[#allocation2 + $0xf0] sm:$0xff] }
 0x138   : > { %v1066_v42 = vmax.f32 %v1034_v34, 0.0  ;;  %v996_v44 = vmul.f32 %v1866_v13, %v957_v38  ;;  %v1362_v49 = vpop.f32.mrf.mxu0  ;;  %v1410_v50 = vpop.f32.mrf.mxu1 }
 0x139   : > { %1082 = vst.msk [vmem:[%s1883_s6 + $0x38] sm:$0xff] %vm319_vm0, %v1050_v41  ;;  %v1019_v51 = vadd.f32 %v1871_v16, %v980_v43  ;;  %v876_v55 = vadd.f32 %v1361_v47, %v363_v45  ;;  %v892_v56 = vadd.f32 %v1409_v48, %v379_v46  ;;  %v367_v47 = vld [vmem:[#allocation2 + $0x78] sm:$0xff] }
 0x13a   : > { %1098 = vst.msk [vmem:[%s1883_s6 + $0xb8] sm:$0xff] %vm319_vm0, %v1066_v42  ;;  %v1035_v52 = vadd.f32 %v1871_v16, %v996_v44  ;;  %v942_v53 = vld [vmem:[#allocation2 + $0x48] sm:$0xff]  ;;  %v1363_v57 = vpop.f32.mrf.mxu0  ;;  %v1411_v58 = vpop.f32.mrf.mxu1 }
 0x13b   : > { %v958_v54 = vld [vmem:[#allocation2 + $0xc8] sm:$0xff]  ;;  %v1051_v59 = vmax.f32 %v1019_v51, 0.0  ;;  %v981_v61 = vmul.f32 %v1866_v13, %v942_v53  ;;  %909 = vst.msk [vmem:[#allocation2 + $0x58] sm:$0xff] %vm319_vm0, %v876_v55  ;;  %925 = vst.msk [vmem:[#allocation2 + $0xd8] sm:$0xff] %vm319_vm0, %v892_v56  ;;  %v1364_v1 = vadd.f32 %v1363_v57, %v1362_v49  ;;  %v1412_v2 = vadd.f32 %v1411_v58, %v1410_v50  ;;  %v383_v49 = vld [vmem:[#allocation2 + $0xf8] sm:$0xff] }
 0x13c   : > { %v1067_v60 = vmax.f32 %v1035_v52, 0.0  ;;  %v997_v62 = vmul.f32 %v1866_v13, %v958_v54  ;;  %v1365_v3 = vpop.f32.mrf.mxu0  ;;  %v1413_v4 = vpop.f32.mrf.mxu1 }
 0x13d   : > { %1083 = vst.msk [vmem:[%s1883_s6 + $0x40] sm:$0xff] %vm319_vm0, %v1051_v59  ;;  %v1020_v5 = vadd.f32 %v1871_v16, %v981_v61  ;;  %v877_v9 = vadd.f32 %v1364_v1, %v364_v63  ;;  %v893_v10 = vadd.f32 %v1412_v2, %v380_v0 }
 0x13e   : > { %1099 = vst.msk [vmem:[%s1883_s6 + $0xc0] sm:$0xff] %vm319_vm0, %v1067_v60  ;;  %v1036_v6 = vadd.f32 %v1871_v16, %v997_v62  ;;  %v943_v7 = vld [vmem:[#allocation2 + $0x50] sm:$0xff]  ;;  %v1366_v11 = vpop.f32.mrf.mxu0  ;;  %v1414_v12 = vpop.f32.mrf.mxu1 }
 0x13f   : > { %v959_v8 = vld [vmem:[#allocation2 + $0xd0] sm:$0xff]  ;;  %v1052_v14 = vmax.f32 %v1020_v5, 0.0  ;;  %v982_v17 = vmul.f32 %v1866_v13, %v943_v7  ;;  %910 = vst.msk [vmem:[#allocation2 + $0x60] sm:$0xff] %vm319_vm0, %v877_v9  ;;  %926 = vst.msk [vmem:[#allocation2 + $0xe0] sm:$0xff] %vm319_vm0, %v893_v10  ;;  %v1367_v21 = vadd.f32 %v1366_v11, %v1365_v3  ;;  %v1415_v22 = vadd.f32 %v1414_v12, %v1413_v4 }
 0x140   : > { %v1068_v15 = vmax.f32 %v1036_v6, 0.0  ;;  %v998_v18 = vmul.f32 %v1866_v13, %v959_v8  ;;  %v1368_v23 = vpop.f32.mrf.mxu0  ;;  %v1416_v24 = vpop.f32.mrf.mxu1 }
 0x141   : > { %1084 = vst.msk [vmem:[%s1883_s6 + $0x48] sm:$0xff] %vm319_vm0, %v1052_v14  ;;  %v1021_v25 = vadd.f32 %v1871_v16, %v982_v17  ;;  %v878_v27 = vadd.f32 %v1367_v21, %v365_v19  ;;  %v894_v28 = vadd.f32 %v1415_v22, %v381_v20 }
 0x142   : > { %1100 = vst.msk [vmem:[%s1883_s6 + $0xc8] sm:$0xff] %vm319_vm0, %v1068_v15  ;;  %v1037_v26 = vadd.f32 %v1871_v16, %v998_v18  ;;  %v1369_v30 = vpop.f32.mrf.mxu0  ;;  %v1417_v32 = vpop.f32.mrf.mxu1  ;;  %v944_v35 = vld [vmem:[#allocation2 + $0x58] sm:$0xff] }
 0x143   : > { %v1053_v33 = vmax.f32 %v1021_v25, 0.0  ;;  %v960_v36 = vld [vmem:[#allocation2 + $0xd8] sm:$0xff]  ;;  %v1370_v37 = vadd.f32 %v1369_v30, %v1368_v23  ;;  %v1418_v38 = vadd.f32 %v1417_v32, %v1416_v24  ;;  %v983_v39 = vmul.f32 %v1866_v13, %v944_v35  ;;  %911 = vst.msk [vmem:[#allocation2 + $0x68] sm:$0xff] %vm319_vm0, %v878_v27  ;;  %927 = vst.msk [vmem:[#allocation2 + $0xe8] sm:$0xff] %vm319_vm0, %v894_v28 }
 0x144   : > { %v1069_v34 = vmax.f32 %v1037_v26, 0.0  ;;  %v999_v40 = vmul.f32 %v1866_v13, %v960_v36  ;;  %v1371_v41 = vpop.f32.mrf.mxu0  ;;  %v1419_v42 = vpop.f32.mrf.mxu1 }
 0x145   : > { %1085 = vst.msk [vmem:[%s1883_s6 + $0x50] sm:$0xff] %vm319_vm0, %v1053_v33  ;;  %v879_v43 = vadd.f32 %v1370_v37, %v366_v29  ;;  %v895_v44 = vadd.f32 %v1418_v38, %v382_v31  ;;  %v1022_v45 = vadd.f32 %v1871_v16, %v983_v39 }
 0x146   : > { %1101 = vst.msk [vmem:[%s1883_s6 + $0xd0] sm:$0xff] %vm319_vm0, %v1069_v34  ;;  %v1038_v46 = vadd.f32 %v1871_v16, %v999_v40  ;;  %v1372_v48 = vpop.f32.mrf.mxu0  ;;  %v1420_v50 = vpop.f32.mrf.mxu1  ;;  %v945_v51 = vld [vmem:[#allocation2 + $0x60] sm:$0xff] }
 0x147   : > { %v961_v52 = vld [vmem:[#allocation2 + $0xe0] sm:$0xff]  ;;  %912 = vst.msk [vmem:[#allocation2 + $0x70] sm:$0xff] %vm319_vm0, %v879_v43  ;;  %928 = vst.msk [vmem:[#allocation2 + $0xf0] sm:$0xff] %vm319_vm0, %v895_v44  ;;  %v1373_v53 = vadd.f32 %v1372_v48, %v1371_v41  ;;  %v1421_v54 = vadd.f32 %v1420_v50, %v1419_v42  ;;  %v1054_v55 = vmax.f32 %v1022_v45, 0.0  ;;  %v984_v57 = vmul.f32 %v1866_v13, %v945_v51 }
 0x148   : > { %v1070_v56 = vmax.f32 %v1038_v46, 0.0  ;;  %v1000_v58 = vmul.f32 %v1866_v13, %v961_v52 }
 0x149   : > { %v880_v59 = vadd.f32 %v1373_v53, %v367_v47  ;;  %v896_v60 = vadd.f32 %v1421_v54, %v383_v49  ;;  %1086 = vst.msk [vmem:[%s1883_s6 + $0x58] sm:$0xff] %vm319_vm0, %v1054_v55  ;;  %v1023_v61 = vadd.f32 %v1871_v16, %v984_v57 }
 0x14a   : > { %1102 = vst.msk [vmem:[%s1883_s6 + $0xd8] sm:$0xff] %vm319_vm0, %v1070_v56  ;;  %v1039_v62 = vadd.f32 %v1871_v16, %v1000_v58  ;;  %v946_v63 = vld [vmem:[#allocation2 + $0x68] sm:$0xff] }
 0x14b   : > { %v962_v0 = vld [vmem:[#allocation2 + $0xe8] sm:$0xff]  ;;  %913 = vst.msk [vmem:[#allocation2 + $0x78] sm:$0xff] %vm319_vm0, %v880_v59  ;;  %929 = vst.msk [vmem:[#allocation2 + $0xf8] sm:$0xff] %vm319_vm0, %v896_v60  ;;  %v1055_v1 = vmax.f32 %v1023_v61, 0.0  ;;  %v985_v3 = vmul.f32 %v1866_v13, %v946_v63 }
 0x14c   : > { %v1071_v2 = vmax.f32 %v1039_v62, 0.0  ;;  %v1001_v4 = vmul.f32 %v1866_v13, %v962_v0 }
 0x14d   : > { %1087 = vst.msk [vmem:[%s1883_s6 + $0x60] sm:$0xff] %vm319_vm0, %v1055_v1  ;;  %v1024_v5 = vadd.f32 %v1871_v16, %v985_v3 }
 0x14e   : > { %1103 = vst.msk [vmem:[%s1883_s6 + $0xe0] sm:$0xff] %vm319_vm0, %v1071_v2  ;;  %v1040_v6 = vadd.f32 %v1871_v16, %v1001_v4  ;;  %v947_v7 = vld [vmem:[#allocation2 + $0x70] sm:$0xff] }
 0x14f   : > { %v963_v8 = vld [vmem:[#allocation2 + $0xf0] sm:$0xff]  ;;  %v986_v9 = vmul.f32 %v1866_v13, %v947_v7  ;;  %v1056_v11 = vmax.f32 %v1024_v5, 0.0 }
 0x150   : > { %v1002_v10 = vmul.f32 %v1866_v13, %v963_v8  ;;  %v1072_v12 = vmax.f32 %v1040_v6, 0.0 }
 0x151   : > { %v1025_v14 = vadd.f32 %v1871_v16, %v986_v9  ;;  %1088 = vst.msk [vmem:[%s1883_s6 + $0x68] sm:$0xff] %vm319_vm0, %v1056_v11 }
 0x152   : > { %v1041_v15 = vadd.f32 %v1871_v16, %v1002_v10  ;;  %1104 = vst.msk [vmem:[%s1883_s6 + $0xe8] sm:$0xff] %vm319_vm0, %v1072_v12  ;;  %v948_v17 = vld [vmem:[#allocation2 + $0x78] sm:$0xff] }
 0x153   : > { %v964_v18 = vld [vmem:[#allocation2 + $0xf8] sm:$0xff]  ;;  %v1057_v19 = vmax.f32 %v1025_v14, 0.0  ;;  %v987_v21 = vmul.f32 %v1866_v13, %v948_v17 }
 0x154   : > { %v1073_v20 = vmax.f32 %v1041_v15, 0.0  ;;  %v1003_v22 = vmul.f32 %v1866_v13, %v964_v18 }
 0x155   : > { %1089 = vst.msk [vmem:[%s1883_s6 + $0x70] sm:$0xff] %vm319_vm0, %v1057_v19  ;;  %v1026_v23 = vadd.f32 %v1871_v16, %v987_v21 }
 0x156   : > { %1105 = vst.msk [vmem:[%s1883_s6 + $0xf0] sm:$0xff] %vm319_vm0, %v1073_v20  ;;  %v1042_v24 = vadd.f32 %v1871_v16, %v1003_v22 }
 0x157   : > { %v1058_v25 = vmax.f32 %v1026_v23, 0.0 }
 0x158   : > { %v1074_v26 = vmax.f32 %v1042_v24, 0.0 }
 0x159   : > { %1090 = vst.msk [vmem:[%s1883_s6 + $0x78] sm:$0xff] %vm319_vm0, %v1058_v25 }
 0x15a   : > { %1106 = vst.msk [vmem:[%s1883_s6 + $0xf8] sm:$0xff] %vm319_vm0, %v1074_v26 }
 0x15b PF: > { %s17_s20 = sadd.s32 1, %s1638_s20   ;;  %s2061_s15 = smov %s1622_s16 }
 0x15c   : > { %p14_p8 = scmp.ge.s32.totalorder %s17_s20, 4   ;;  %s2062_s16 = smov %s1626_s17 }
 0x15d   : > { %s2063_s17 = smov %s1718_s27  ;;  %s2064_s18 = smov %s1634_s19 }
 0x15e   : > { %s2065_s19 = smov %s2067_s22  ;;  %16 = sbr.rel (!%p14_p8) target bundleno = 4 (0x4), region = 93 }
 0x163   :  { %1135 = vsyncpa [#allocation4], 1 }
 0x164   :  { %1137 = vsyncpa [#allocation4 + $0x1], 1 }

</bundles_post_ra>
